<compile_context>
chip_gen: v5e
topology: v5e:2x2
jax: 0.10.0
libtpu: 0.0.40
codegen_flags: <defaults>
</compile_context>

<pallas_src>
import functools

import jax
import jax.numpy as jnp
import numpy as np
from jax import lax
from jax.experimental import pallas as pl
from jax.experimental.pallas import tpu as pltpu

KH = KW = 3
PAD = 1
EPS = 1e-5
NEG_SLOPE = 0.1
SUBLANE = 8


def _shift_flat(xn, offset, cin, hw):
    """xn: (Cin, H*W).  Returns s with s[:, p] = xn[:, p + offset] (zero-filled at the
    array ends).  Row/column wrap positions are cleaned up by the per-tap mask."""
    if offset == 0:
        return xn
    if offset > 0:
        return jnp.concatenate(
            [xn[:, offset:], jnp.zeros((cin, offset), xn.dtype)], axis=1)
    o = -offset
    return jnp.concatenate(
        [jnp.zeros((cin, o), xn.dtype), xn[:, :hw - o]], axis=1)


def _deblock2d_kernel(x_ref, w_ref, mask_ref, scale_ref, shift_ref, o_ref, *, img_w):
    # x_ref     : (1, Cin, H*W)      one image, NCHW flattened (lane axis = H*W, dense)
    # w_ref     : (Cout_p, 9*Cin)    fused-GEMM conv weight (resident)
    # mask_ref  : (9, H*W)           per-tap zero-padding validity masks (resident)
    # scale_ref : (Cin, 1)  BN scale (gamma * rsqrt(var + eps))
    # shift_ref : (Cin, 1)  BN shift (beta - mean * scale)
    # o_ref     : (1, Cout_p, H*W)   output block, already NCHW-flattened
    _, cin, hw = x_ref.shape
    cout_p = w_ref.shape[0]

    # BatchNorm2d as a per-channel affine (stats precomputed in the wrapper).
    xn = x_ref[...].reshape(cin, hw) * scale_ref[...] + shift_ref[...]   # (Cin, HW)

    masks = mask_ref[...]                                                # (9, HW)

    # im2col: 9 shifted + masked copies stacked along K -> one fused GEMM (K = 9*Cin).
    parts = []
    for kh in range(KH):
        for kw in range(KW):
            tap = kh * KW + kw
            offset = (kh - PAD) * img_w + (kw - PAD)
            s = _shift_flat(xn, offset, cin, hw)
            parts.append(s * masks[tap:tap + 1, :])
    patches = jnp.concatenate(parts, axis=0)                             # (9*Cin, HW)

    # Single MXU matmul: (Cout_p, 9*Cin) @ (9*Cin, HW) -> (Cout_p, HW), lane-dense.
    y = jnp.dot(w_ref[...], patches, preferred_element_type=jnp.float32)

    # LeakyReLU(0.1) and one lane-dense store.
    y = jnp.maximum(y, NEG_SLOPE * y)
    o_ref[...] = y.reshape(1, cout_p, hw).astype(o_ref.dtype)


def deblock2d_forward(x_nchw, w_t, gamma, beta):
    """x_nchw: (N, Cin, H, W); w_t: ConvTranspose2d weight (Cin, Cout, KH, KW);
    gamma/beta: (Cin,).  Returns (N, Cout, H, W)."""
    N, Cin, H, W = x_nchw.shape
    Cout = w_t.shape[1]
    HW = H * W
    cout_p = ((Cout + SUBLANE - 1) // SUBLANE) * SUBLANE   # sublane pad only

    x = x_nchw.astype(jnp.float32)

    # --- BatchNorm2d training-mode stats (biased variance): tiny reduction, once ---
    mean = jnp.mean(x, axis=(0, 2, 3))
    var = jnp.var(x, axis=(0, 2, 3))                       # biased (ddof=0)
    scale = (gamma.astype(jnp.float32) * lax.rsqrt(var + EPS)).reshape(Cin, 1)
    shift = (beta.astype(jnp.float32) - mean * scale[:, 0]).reshape(Cin, 1)

    # --- ConvTranspose2d(stride=1, pad=1) -> equivalent Conv2d(pad=1), fused weight ---
    # wc[o, c, kh, kw] = w_t[c, o, KH-1-kh, KW-1-kw]; stored as (Cout_p, 9*Cin) with
    # column index (kh*KW + kw)*Cin + c matching the im2col stacking order.
    w_flip = jnp.flip(w_t.astype(jnp.float32), axis=(2, 3))           # (Cin, Cout, 3, 3)
    w2 = jnp.transpose(w_flip, (1, 2, 3, 0)).reshape(Cout, KH * KW * Cin)
    w2 = jnp.pad(w2, ((0, cout_p - Cout), (0, 0)))                    # (Cout_p, 9*Cin)

    # --- per-tap validity masks (zero padding of the *post-BN* tensor), once ---
    ii = jnp.arange(H).reshape(H, 1)
    jj = jnp.arange(W).reshape(1, W)
    mask_list = []
    for kh in range(KH):
        for kw in range(KW):
            dh, dw = kh - PAD, kw - PAD
            m = ((ii + dh >= 0) & (ii + dh < H) & (jj + dw >= 0) & (jj + dw < W))
            mask_list.append(m.astype(jnp.float32).reshape(1, HW))
    masks = jnp.concatenate(mask_list, axis=0)                        # (9, HW)

    # Free reshape (contiguous): NCHW -> (N, Cin, H*W); no wrapper transposes.
    x_flat = x.reshape(N, Cin, HW)

    kern = functools.partial(_deblock2d_kernel, img_w=W)
    out = pl.pallas_call(
        kern,
        out_shape=jax.ShapeDtypeStruct((N, cout_p, HW), jnp.float32),
        grid=(N,),
        in_specs=[
            pl.BlockSpec((1, Cin, HW), lambda n: (n, 0, 0)),
            pl.BlockSpec((cout_p, KH * KW * Cin), lambda n: (0, 0)),   # resident
            pl.BlockSpec((KH * KW, HW), lambda n: (0, 0)),             # resident
            pl.BlockSpec((Cin, 1), lambda n: (0, 0)),                  # resident
            pl.BlockSpec((Cin, 1), lambda n: (0, 0)),                  # resident
        ],
        out_specs=pl.BlockSpec((1, cout_p, HW), lambda n: (n, 0, 0)),
        compiler_params=pltpu.CompilerParams(
            dimension_semantics=("parallel",),   # megacore split on v7x; no-op v5e/v6e
        ),
    )(x_flat, w2, masks, scale, shift)

    # Slice off sublane padding; output is already NCHW-flattened (free reshape).
    return out[:, :Cout, :].reshape(N, Cout, H, W)


def deblock2d_reference(x_nchw, w_t, gamma, beta):
    """Independent pure-JAX reference: training-mode BN -> direct (scatter-form)
    ConvTranspose2d(stride=1, pad=1, output_pad=0, no bias) -> LeakyReLU(0.1)."""
    x = x_nchw.astype(jnp.float32)
    N, Cin, H, W = x.shape
    Cout = w_t.shape[1]

    mean = jnp.mean(x, axis=(0, 2, 3), keepdims=True)
    var = jnp.mean((x - mean) ** 2, axis=(0, 2, 3), keepdims=True)
    xn = (x - mean) * lax.rsqrt(var + EPS) * gamma.reshape(1, -1, 1, 1) \
         + beta.reshape(1, -1, 1, 1)

    # out[n,o, i - pad + kh, j - pad + kw] += xn[n,c,i,j] * w[c,o,kh,kw]
    full = jnp.zeros((N, Cout, H + KH - 1, W + KW - 1), jnp.float32)
    w32 = w_t.astype(jnp.float32)
    for kh in range(KH):
        for kw in range(KW):
            contrib = jnp.einsum('ncij,co->noij', xn, w32[:, :, kh, kw])
            full = full.at[:, :, kh:kh + H, kw:kw + W].add(contrib)
    y = full[:, :, PAD:PAD + H, PAD:PAD + W]
    return jnp.where(y >= 0, y, NEG_SLOPE * y)


if __name__ == "__main__":
    # Small deterministic problem: DeBlock2D(cin=4, cout=8) on x of shape (2, 4, 16, 16).
    N, CIN, COUT, H, W = 2, 4, 8, 16, 16
    key = jax.random.PRNGKey(0)
    kx, kw = jax.random.split(key)

    x = jax.random.normal(kx, (N, CIN, H, W), dtype=jnp.float32)

    # Parameters per the module __init__ (deterministic):
    #   BatchNorm2d(cin): weight=1, bias=0 (PyTorch default init)
    #   ConvTranspose2d(cin, cout, 3, stride=1, padding=1, bias=False): weight (Cin, Cout, 3, 3)
    gamma = jnp.ones((CIN,), dtype=jnp.float32)
    beta = jnp.zeros((CIN,), dtype=jnp.float32)
    bound = 1.0 / np.sqrt(CIN * KH * KW)
    w_convT = jax.random.uniform(kw, (CIN, COUT, KH, KW), dtype=jnp.float32,
                                 minval=-bound, maxval=bound)

    out = deblock2d_forward(x, w_convT, gamma, beta)
    out = jax.block_until_ready(out)

    ref = deblock2d_reference(x, w_convT, gamma, beta)
    np.testing.assert_allclose(np.asarray(out), np.asarray(ref), rtol=1e-4, atol=1e-4)
    assert out.shape == (N, COUT, H, W) and out.dtype == jnp.float32

    print("KERNEL_OK")
</pallas_src>

<mosaic_0001>
module attributes {stable_mosaic.version = 11 : i64} {
  func.func @_deblock2d_kernel(%arg0: i32, %arg1: memref<1x4x256xf32, #tpu.memory_space<vmem>>, %arg2: memref<8x36xf32, #tpu.memory_space<vmem>>, %arg3: memref<9x256xf32, #tpu.memory_space<vmem>>, %arg4: memref<4x1xf32, #tpu.memory_space<vmem>>, %arg5: memref<4x1xf32, #tpu.memory_space<vmem>>, %arg6: memref<1x8x256xf32, #tpu.memory_space<vmem>>) attributes {dimension_semantics = [#tpu.dimension_semantics<parallel>], iteration_bounds = array<i64: 2>, scalar_prefetch = 0 : i64, scratch_operands = 0 : i64, tpu.core_type = #tpu.core_type<tc>, window_params = [{transform_indices = @transform_0, window_bounds = array<i64: 1, 4, 256>}, {pipeline_mode = #tpu.pipeline_mode<synchronous>, transform_indices = @transform_1, window_bounds = array<i64: 8, 36>}, {pipeline_mode = #tpu.pipeline_mode<synchronous>, transform_indices = @transform_2, window_bounds = array<i64: 9, 256>}, {pipeline_mode = #tpu.pipeline_mode<synchronous>, transform_indices = @transform_3, window_bounds = array<i64: 4, 1>}, {pipeline_mode = #tpu.pipeline_mode<synchronous>, transform_indices = @transform_4, window_bounds = array<i64: 4, 1>}, {transform_indices = @transform_5, window_bounds = array<i64: 1, 8, 256>}]} {
    %c0 = arith.constant 0 : index
    %c0_0 = arith.constant 0 : index
    %c0_1 = arith.constant 0 : index
    %0 = vector.load %arg1[%c0, %c0_0, %c0_1] : memref<1x4x256xf32, #tpu.memory_space<vmem>>, vector<1x4x256xf32>
    %1 = vector.shape_cast %0 : vector<1x4x256xf32> to vector<4x256xf32>
    %c0_2 = arith.constant 0 : index
    %c0_3 = arith.constant 0 : index
    %2 = vector.load %arg4[%c0_2, %c0_3] : memref<4x1xf32, #tpu.memory_space<vmem>>, vector<4x1xf32>
    %3 = vector.broadcast %2 : vector<4x1xf32> to vector<4x256xf32>
    %4 = arith.mulf %1, %3 : vector<4x256xf32>
    %c0_4 = arith.constant 0 : index
    %c0_5 = arith.constant 0 : index
    %5 = vector.load %arg5[%c0_4, %c0_5] : memref<4x1xf32, #tpu.memory_space<vmem>>, vector<4x1xf32>
    %6 = vector.broadcast %5 : vector<4x1xf32> to vector<4x256xf32>
    %7 = arith.addf %4, %6 : vector<4x256xf32>
    %c0_6 = arith.constant 0 : index
    %c0_7 = arith.constant 0 : index
    %8 = vector.load %arg3[%c0_6, %c0_7] : memref<9x256xf32, #tpu.memory_space<vmem>>, vector<9x256xf32>
    %cst = arith.constant 0.000000e+00 : f32
    %9 = vector.broadcast %cst : f32 to vector<4x17xf32>
    %10 = vector.extract_strided_slice %7 {offsets = [0, 0], sizes = [4, 239], strides = [1, 1]} : vector<4x256xf32> to vector<4x239xf32>
    %11 = tpu.concatenate %9, %10 in 1 : vector<4x17xf32>, vector<4x239xf32> -> vector<4x256xf32>
    %12 = vector.extract_strided_slice %8 {offsets = [0, 0], sizes = [1, 256], strides = [1, 1]} : vector<9x256xf32> to vector<1x256xf32>
    %13 = vector.broadcast %12 : vector<1x256xf32> to vector<4x256xf32>
    %14 = arith.mulf %11, %13 : vector<4x256xf32>
    %cst_8 = arith.constant 0.000000e+00 : f32
    %15 = vector.broadcast %cst_8 : f32 to vector<4x16xf32>
    %16 = vector.extract_strided_slice %7 {offsets = [0, 0], sizes = [4, 240], strides = [1, 1]} : vector<4x256xf32> to vector<4x240xf32>
    %17 = tpu.concatenate %15, %16 in 1 : vector<4x16xf32>, vector<4x240xf32> -> vector<4x256xf32>
    %18 = vector.extract_strided_slice %8 {offsets = [1, 0], sizes = [1, 256], strides = [1, 1]} : vector<9x256xf32> to vector<1x256xf32>
    %19 = vector.broadcast %18 : vector<1x256xf32> to vector<4x256xf32>
    %20 = arith.mulf %17, %19 : vector<4x256xf32>
    %cst_9 = arith.constant 0.000000e+00 : f32
    %21 = vector.broadcast %cst_9 : f32 to vector<4x15xf32>
    %22 = vector.extract_strided_slice %7 {offsets = [0, 0], sizes = [4, 241], strides = [1, 1]} : vector<4x256xf32> to vector<4x241xf32>
    %23 = tpu.concatenate %21, %22 in 1 : vector<4x15xf32>, vector<4x241xf32> -> vector<4x256xf32>
    %24 = vector.extract_strided_slice %8 {offsets = [2, 0], sizes = [1, 256], strides = [1, 1]} : vector<9x256xf32> to vector<1x256xf32>
    %25 = vector.broadcast %24 : vector<1x256xf32> to vector<4x256xf32>
    %26 = arith.mulf %23, %25 : vector<4x256xf32>
    %cst_10 = arith.constant 0.000000e+00 : f32
    %27 = vector.broadcast %cst_10 : f32 to vector<4x1xf32>
    %28 = vector.extract_strided_slice %7 {offsets = [0, 0], sizes = [4, 255], strides = [1, 1]} : vector<4x256xf32> to vector<4x255xf32>
    %29 = tpu.concatenate %27, %28 in 1 : vector<4x1xf32>, vector<4x255xf32> -> vector<4x256xf32>
    %30 = vector.extract_strided_slice %8 {offsets = [3, 0], sizes = [1, 256], strides = [1, 1]} : vector<9x256xf32> to vector<1x256xf32>
    %31 = vector.broadcast %30 : vector<1x256xf32> to vector<4x256xf32>
    %32 = arith.mulf %29, %31 : vector<4x256xf32>
    %33 = vector.extract_strided_slice %8 {offsets = [4, 0], sizes = [1, 256], strides = [1, 1]} : vector<9x256xf32> to vector<1x256xf32>
    %34 = vector.broadcast %33 : vector<1x256xf32> to vector<4x256xf32>
    %35 = arith.mulf %7, %34 : vector<4x256xf32>
    %36 = vector.extract_strided_slice %7 {offsets = [0, 1], sizes = [4, 255], strides = [1, 1]} : vector<4x256xf32> to vector<4x255xf32>
    %cst_11 = arith.constant 0.000000e+00 : f32
    %37 = vector.broadcast %cst_11 : f32 to vector<4x1xf32>
    %38 = tpu.concatenate %36, %37 in 1 : vector<4x255xf32>, vector<4x1xf32> -> vector<4x256xf32>
    %39 = vector.extract_strided_slice %8 {offsets = [5, 0], sizes = [1, 256], strides = [1, 1]} : vector<9x256xf32> to vector<1x256xf32>
    %40 = vector.broadcast %39 : vector<1x256xf32> to vector<4x256xf32>
    %41 = arith.mulf %38, %40 : vector<4x256xf32>
    %42 = vector.extract_strided_slice %7 {offsets = [0, 15], sizes = [4, 241], strides = [1, 1]} : vector<4x256xf32> to vector<4x241xf32>
    %cst_12 = arith.constant 0.000000e+00 : f32
    %43 = vector.broadcast %cst_12 : f32 to vector<4x15xf32>
    %44 = tpu.concatenate %42, %43 in 1 : vector<4x241xf32>, vector<4x15xf32> -> vector<4x256xf32>
    %45 = vector.extract_strided_slice %8 {offsets = [6, 0], sizes = [1, 256], strides = [1, 1]} : vector<9x256xf32> to vector<1x256xf32>
    %46 = vector.broadcast %45 : vector<1x256xf32> to vector<4x256xf32>
    %47 = arith.mulf %44, %46 : vector<4x256xf32>
    %48 = vector.extract_strided_slice %7 {offsets = [0, 16], sizes = [4, 240], strides = [1, 1]} : vector<4x256xf32> to vector<4x240xf32>
    %cst_13 = arith.constant 0.000000e+00 : f32
    %49 = vector.broadcast %cst_13 : f32 to vector<4x16xf32>
    %50 = tpu.concatenate %48, %49 in 1 : vector<4x240xf32>, vector<4x16xf32> -> vector<4x256xf32>
    %51 = vector.extract_strided_slice %8 {offsets = [7, 0], sizes = [1, 256], strides = [1, 1]} : vector<9x256xf32> to vector<1x256xf32>
    %52 = vector.broadcast %51 : vector<1x256xf32> to vector<4x256xf32>
    %53 = arith.mulf %50, %52 : vector<4x256xf32>
    %54 = vector.extract_strided_slice %7 {offsets = [0, 17], sizes = [4, 239], strides = [1, 1]} : vector<4x256xf32> to vector<4x239xf32>
    %cst_14 = arith.constant 0.000000e+00 : f32
    %55 = vector.broadcast %cst_14 : f32 to vector<4x17xf32>
    %56 = tpu.concatenate %54, %55 in 1 : vector<4x239xf32>, vector<4x17xf32> -> vector<4x256xf32>
    %57 = vector.extract_strided_slice %8 {offsets = [8, 0], sizes = [1, 256], strides = [1, 1]} : vector<9x256xf32> to vector<1x256xf32>
    %58 = vector.broadcast %57 : vector<1x256xf32> to vector<4x256xf32>
    %59 = arith.mulf %56, %58 : vector<4x256xf32>
    %60 = tpu.concatenate %14, %20, %26, %32, %35, %41, %47, %53, %59 in 0 : vector<4x256xf32>, vector<4x256xf32>, vector<4x256xf32>, vector<4x256xf32>, vector<4x256xf32>, vector<4x256xf32>, vector<4x256xf32>, vector<4x256xf32>, vector<4x256xf32> -> vector<36x256xf32>
    %c0_15 = arith.constant 0 : index
    %c0_16 = arith.constant 0 : index
    %61 = vector.load %arg2[%c0_15, %c0_16] : memref<8x36xf32, #tpu.memory_space<vmem>>, vector<8x36xf32>
    %cst_17 = arith.constant dense<0.000000e+00> : vector<8x256xf32>
    %62 = tpu.matmul %61, %60, %cst_17 {dimension_numbers = #tpu.dot_dimension_numbers<[1], [0], [0], [1], [0, 0, 1, 1], [], []>} : vector<8x36xf32>, vector<36x256xf32>, vector<8x256xf32> -> vector<8x256xf32>
    %cst_18 = arith.constant 1.000000e-01 : f32
    %63 = vector.broadcast %cst_18 : f32 to vector<8x256xf32>
    %64 = arith.mulf %63, %62 : vector<8x256xf32>
    %65 = arith.maximumf %62, %64 : vector<8x256xf32>
    %66 = vector.shape_cast %65 : vector<8x256xf32> to vector<1x8x256xf32>
    %c0_19 = arith.constant 0 : index
    %c0_20 = arith.constant 0 : index
    %c0_21 = arith.constant 0 : index
    %67 = vector.load %arg6[%c0_19, %c0_20, %c0_21] : memref<1x8x256xf32, #tpu.memory_space<vmem>>, vector<1x8x256xf32>
    tpu.vector_store %arg6[%c0_19, %c0_20, %c0_21], %66 {strides = array<i32>} : memref<1x8x256xf32, #tpu.memory_space<vmem>>, vector<1x8x256xf32>,
    return
  }
  func.func @transform_0(%arg0: i32) -> (i32, i32, i32) {
    %c0_i32 = arith.constant 0 : i32
    %c0_i32_0 = arith.constant 0 : i32
    %c0_i32_1 = arith.constant 0 : i32
    return %arg0, %c0_i32, %c0_i32_0 : i32, i32, i32
  }
  func.func @transform_1(%arg0: i32) -> (i32, i32) {
    %c0_i32 = arith.constant 0 : i32
    %c0_i32_0 = arith.constant 0 : i32
    %c0_i32_1 = arith.constant 0 : i32
    return %c0_i32, %c0_i32_0 : i32, i32
  }
  func.func @transform_2(%arg0: i32) -> (i32, i32) {
    %c0_i32 = arith.constant 0 : i32
    %c0_i32_0 = arith.constant 0 : i32
    %c0_i32_1 = arith.constant 0 : i32
    return %c0_i32, %c0_i32_0 : i32, i32
  }
  func.func @transform_3(%arg0: i32) -> (i32, i32) {
    %c0_i32 = arith.constant 0 : i32
    %c0_i32_0 = arith.constant 0 : i32
    %c0_i32_1 = arith.constant 0 : i32
    return %c0_i32, %c0_i32_0 : i32, i32
  }
  func.func @transform_4(%arg0: i32) -> (i32, i32) {
    %c0_i32 = arith.constant 0 : i32
    %c0_i32_0 = arith.constant 0 : i32
    %c0_i32_1 = arith.constant 0 : i32
    return %c0_i32, %c0_i32_0 : i32, i32
  }
  func.func @transform_5(%arg0: i32) -> (i32, i32, i32) {
    %c0_i32 = arith.constant 0 : i32
    %c0_i32_0 = arith.constant 0 : i32
    %c0_i32_1 = arith.constant 0 : i32
    return %arg0, %c0_i32, %c0_i32_0 : i32, i32, i32
  }
}

</mosaic_0001>

<bundles_post_ra>
// kernel: tpu_custom_call.1
= control target key start
LH: loop header
LB: loop body
LE: loop exit
PB: predicated region body
PF: predicated region fallthrough
CT: control target
= control target key end

     0   :  { %10 = vsyncpa [#allocation3], 0  ;;  %s1073_s0 = inlined_call_operand.hbm [shape: f32[2,4,256], index: 0, kind: input, shape index: {}]   ;;  %s1074_s1 = inlined_call_operand.vmem [shape: f32[8,36], index: 1, kind: input, shape index: {}]   ;;  %s1075_s2 = inlined_call_operand.hbm [shape: f32[9,256], index: 2, kind: input, shape index: {}]   ;;  %s1076_s3 = inlined_call_operand.vmem [shape: f32[4,1], index: 3, kind: input, shape index: {}]   ;;  %s1077_s4 = inlined_call_operand.vmem [shape: f32[4,1], index: 4, kind: input, shape index: {}]   ;;  %s1078_s5 = inlined_call_operand.hbm [shape: f32[2,8,256], index: 5, kind: output, shape index: {}]  }
   0x1   :  { %12 = vsyncpa [#allocation3 + $0x1], 0 }
   0x2   :  { %13 = vsyncpa [#allocation6], 0 }
   0x3   :  { %14 = vsyncpa [#allocation4], 0 }
   0x4   :  { %16 = vsyncpa [#allocation4 + $0x1], 0  ;;  %s886_s18 = smov 0   ;;  %s888_s19 = smov 0  }
   0x5   :  { %s890_s20 = smov 0   ;;  %s892_s21 = smov 0  }
   0x6 LB: > { %s177_s24 = sshll.u32 %s1075_s2, 4  ;;  %s910_s25 = sadd.s32 4294967295, %s841_s21   ;;  %s841_s21 = sphi %s892_s21, %s1088_s21   ;;  %s837_s20 = sphi %s890_s20, %s1087_s20   ;;  %s833_s19 = sphi %s888_s19, %s1086_s19   ;;  %s829_s18 = sphi %s886_s18, %s1085_s18   ;;  %s178_s24 = int_to_ptr.hbm [resolvable:$true] %s177_s24 }
   0x7   : > { %p618_p0 = scmp.ge.s32.totalorder %s841_s21, 1  ;;  %p43_p1 = scmp.eq.s32.totalorder %s910_s25, 0 }
   0x8   : > { %p163_p2 = scmp.lt.s32.totalorder %s841_s21, 3  ;;  %s843_s27 = smov [#allocation5]  }
   0x9   : > { %s179_s28 = sshll.u32 %s843_s27, 4  ;;  %s844_s29 = smov 256   ;;  %s180_s28 = int_to_ptr.vmem [resolvable:$true] %s179_s28 }
   0xa   : > { %p915_p3 = pnand %p618_p0, %p163_p2  ;;  %s845_s30 = smov 16  }
   0xb   : > { %s617_s6 = sadd.s32 4294967294, %s841_s21   ;;  %s926_s7 = sadd.s32 1, %s841_s21  }
   0xc   : > { %p647_p4 = pneg %p915_p3  ;;  %s29_s8 = sadd.s32 1, %s837_s20 }
   0xd   : > { %s26_s9 = ssub.s32 %s841_s21, %s926_s7  ;;  %p36_p7 = scmp.ne.s32.totalorder %s837_s20, %s833_s19 }
   0xe   : > { %p648_p6 = pnand %p647_p4, %p43_p1  ;;  %p27_p8 = scmp.eq.s32.totalorder %s26_s9, 0 }
   0xf   : > { %p37_p9 = scmp.eq.s32.totalorder %s841_s21, 0  ;;  %p42_p10 = scmp.ne.s32.totalorder %s833_s19, %s829_s18 }
  0x10   : > { %650 = dma.hbm_to_vmem [thread:$0]  (!%p648_p6), %s178_s24, 512, %s180_s28, [#allocation6], %s844_s29, %s844_s29, %s845_s30  }
  0x11   : > { %p150_p11 = scmp.eq.s32.totalorder %s910_s25, 1  ;;  %p942_p12 = por %p43_p1, %p42_p10 }
  0x12   : > { %s938_s10 = scalar_select %p27_p8, %s837_s20, %s29_s8  }
  0x13   : > { %p946_p13 = por %p150_p11, %p36_p7  ;;  %p156_p0 = scmp.eq.s32.totalorder %s617_s6, 1 }
  0x14   : > { %p38_p2 = por %p37_p9, %p36_p7  ;;  %s199_s13 = sand.u32 1, %s837_s20  }
  0x15   : > { %p951_p4 = por %p156_p0, %p42_p10  ;;  %p660_p6 = scmp.lt.s32.totalorder %s841_s21, 2 }
  0x16   : > { %s621_s15 = sshll.u32 %s199_s13, 3  ;;  %s637_s16 = sshll.u32 %s841_s21, 3 }
  0x17   : > { %s208_s23 = scalar_lea.hbm %s1073_s0, %s637_s16  ;;  %s203_s27 = scalar_lea.vmem [#allocation2], %s621_s15 }
  0x18   : > { %s210_s24 = sshll.u32 %s208_s23, 4  ;;  %s212_s28 = sshll.u32 %s203_s27, 4  ;;  %s211_s24 = int_to_ptr.hbm [resolvable:$true] %s210_s24  ;;  %s213_s28 = int_to_ptr.vmem [resolvable:$true] %s212_s28 }
  0x19   : > { %p960_p8 = pnand %p660_p6, %p38_p2  ;;  %s200_s30 = scalar_lea.sflag [#allocation3], %s199_s13 }
  0x1a   : > { %s741_s6 = sshra.s32 %s211_s24, 4  ;;  %s748_s15 = scalar_lea.hbm %s1073_s0, 16  ;;  %s742_s6 = int_to_ptr.hbm [resolvable:$true] %s741_s6 }
  0x1b   : > { %s743_s8 = scalar_lea.hbm %s742_s6, 8  ;;  %p745_p9 = pneg %p960_p8 }
  0x1c   : > { %p744_p7 = scmp.ne.s32.totalorder %s742_s6, %s743_s8  ;;  %p749_p0 = scmp.lt.s32.totalorder %s742_s6, %s1073_s0 }
  0x1d   : > { %p750_p2 = scmp.lt.s32.totalorder %s748_s15, %s743_s8 }
  0x1e   : > { %p746_p10 = pnand %p745_p9, %p744_p7 }
  0x1f   : > { %p751_p6 = por %p750_p2, %p749_p0 }
  0x20   : > { %p747_p11 = pneg %p746_p10 }
  0x22   : > { %p752_p5 = pnand %p751_p6, %p747_p11 }
  0x24   : > { %755 = shalt.err (!%p752_p5)
}
  0x25   : > { %654 = dma.hbm_to_vmem [thread:$0]  (!%p960_p8), %s211_s24, 128, %s213_s28, %s200_s30  }
  0x26   : > { %221 = sbr.rel (%p915_p3) target bundleno = 501 (0x1f5), region = 40  ;;  %s977_s13 = sand.u32 (!%p915_p3), 1, %s833_s19  }
  0x27   : > { %s625_s23 = sshll.u32 (!%p915_p3), %s977_s13, 3  ;;  %s224_s27 = scalar_lea.sflag (!%p915_p3), [#allocation3], %s977_s13 }
  0x28   : > { %s227_s9 = scalar_lea.vmem (!%p915_p3), [#allocation2], %s625_s23 }
  0x2b   : > { %816 = dma.done.wait (%p942_p12), %s224_s27, 128  }
  0x2c   : > { %818 = vsyncadd (%p942_p12), %s224_s27, 4294967168 }
  0x2d   : > { %820 = dma.done.wait (%p43_p1), [#allocation6], 512  }
  0x2e   : > { %822 = vsyncadd (%p43_p1), [#allocation6], 4294966784  ;;  %v846_v0 = vmov 0   ;;  %v261_v1 = vld [vmem:[%s1076_s3] sm:$0xf]  ;;  %v260_v8 = vld [vmem:[%s227_s9] sm:$0xff] }
  0x2f   : > { %708 = vset.pattern.permute.xlu0 %v846_v0  ;;  %v272_v2 = vld [vmem:[%s1077_s4] sm:$0xf]  ;;  %v847_v3 = vmov 839922192   ;;  %s848_s11 = smov 16   ;;  %s849_s30 = smov 15  }
  0x30   : > { %264 = vperm.xlu0 %708, %v261_v1   ;;  %v267_v4 = vunpack.c.l.s4 %v847_v3  ;;  %s850_s6 = smov 1   ;;  %s851_s8 = smov 127   ;;  %v995_v23 = vld [vmem:[#allocation5 + $0x8] sm:$0xff]  ;;  %v998_v27 = vld [vmem:[#allocation5] sm:$0xff]  ;;  %vm357_vm0 = vcmask 1043456   ;;  %vm416_vm1 = vcmask 908288  }
  0x31   : > { %s852_s16 = smov 113   ;;  %v353_v26 = vperm.slane %v995_v23, 4  ;;  %v352_v28 = vperm.slane %v998_v27, 4  ;;  %s853_s15 = smov 112   ;;  %v709_v44 = vld [vmem:[#allocation5 + $0x10] ss:$0 sm:$0xff] }
  0x32   : > { %v268_v6 = vunpack.c.0.s8 %v267_v4  ;;  %s854_s17 = smov 111   ;;  %s855_s22 = smov 17   ;;  %v710_v45 = vld [vmem:[#allocation5 + $0x18] ss:$0 sm:$0xff]  ;;  %vm368_vm2 = vcmask 1039360   ;;  %vm327_vm3 = vcmask 121856  }
  0x33   : > { %v356_v29 = vrot.slane %v353_v26, 4  ;;  %vm343_vm4 = vcmask 7168   ;;  %v332_v54 = vperm.slane %v998_v27, 2  ;;  %vm311_vm5 = vcmask 130048   ;;  %s627_s9 = sshll.u32 %s977_s13, 4  ;;  %s638_s26 = sshll.u32 %s910_s25, 4 }
  0x34   : > { %v374_v55 = vperm.slane %v995_v23, 5  ;;  %v373_v56 = vperm.slane %v998_v27, 5  ;;  %v316_v57 = vperm.slane %v998_v27, 1  ;;  %v348_v58 = vperm.slane %v998_v27, 3  ;;  %s532_s29 = scalar_lea.hbm %s1078_s5, %s638_s26 }
  0x35   : > { %v358_v32 = vsel %vm357_vm0, %v352_v28, %v356_v29  ;;  %v317_v62 = vperm.slane %v995_v23, 1  ;;  %v349_v63 = vperm.slane %v995_v23, 3  ;;  %vm384_vm6 = vcmask 924672  }
  0x36   : > { %vm400_vm7 = vcmask 916480   ;;  %v405_v1 = vperm.slane %v998_v27, 7  ;;  %vm295_vm8 = vcmask 138240   ;;  %vm464_vm9 = vcmask 293888  }
  0x38   : > { %275 = vperm.xlu0 %708, %v272_v2   ;;  %v406_v2 = vperm.slane %v995_v23, 7 }
  0xa2   : > { %v265_v5 = vpop.permute.xlu0 %264 }
  0xa3   : > { %v269_v7 = vperm.slane %v265_v5, %v268_v6 }
  0xa5   : > { %v271_v10 = vmul.f32 %v269_v7, %v260_v8 }
  0xaa   : > { %v276_v9 = vpop.permute.xlu0 %275 }
  0xab   : > { %v280_v11 = vperm.slane %v276_v9, %v268_v6  ;;  %v389_v6 = vperm.slane %v998_v27, 6 }
  0xad   : > { %v282_v12 = vadd.f32 %v280_v11, %v271_v10  ;;  %v390_v10 = vperm.slane %v995_v23, 6 }
  0xaf   : > { %288 = vst [vmem:[#allocation1] ss:$2 sm:$0xff] %v282_v12  ;;  %v360_v33 = vmul.f32 %v358_v32, %v282_v12 }
  0xb6   : > { %v289_v13 = vld.sshfl [vmem:[#allocation1] sm:$0xff pattern:$0x75316420]  ;;  %v290_v14 = vld.sshfl [vmem:[#allocation1 + $0x8] sm:$0xff pattern:$0x75316420] }
  0xb7   : > { %304 = vst [vmem:[#allocation1] ss:$2 sm:$0xff] %v282_v12 }
  0xbe   : > { %v306_v15 = vld.sshfl [vmem:[#allocation1 + $0x8] sm:$0xff pattern:$0x75316420]  ;;  %v305_v16 = vld.sshfl [vmem:[#allocation1] sm:$0xff pattern:$0x75316420] }
  0xbf   : > { %309 = vrot.lane.b32.xlu1 %v306_v15, %s848_s11  ;;  %307 = vrot.lane.b32.xlu0 %v305_v16, %s848_s11  ;;  %320 = vst [vmem:[#allocation1] ss:$2 sm:$0xff] %v282_v12  ;;  %s259_s11 = scalar_lea.vmem [#allocation7], %s627_s9 }
  0xc6   : > { %v321_v17 = vld.sshfl [vmem:[#allocation1] sm:$0xff pattern:$0x75316420]  ;;  %v322_v18 = vld.sshfl [vmem:[#allocation1 + $0x8] sm:$0xff pattern:$0x75316420] }
  0xc7   : > { %323 = vrot.lane.b32.xlu2 %v321_v17, %s849_s30  ;;  %336 = vst [vmem:[#allocation1] ss:$2 sm:$0xff] %v282_v12 }
  0xce   : > { %v338_v19 = vld.sshfl [vmem:[#allocation1 + $0x8] sm:$0xff pattern:$0x75316420]  ;;  %v337_v20 = vld.sshfl [vmem:[#allocation1] sm:$0xff pattern:$0x75316420] }
  0xcf   : > { %341 = vrot.lane.b32.xlu2 %v338_v19, %s850_s6  ;;  %339 = vrot.lane.b32.xlu1 %v337_v20, %s850_s6  ;;  %361 = vst [vmem:[#allocation1] ss:$2 sm:$0xff] %v282_v12  ;;  %s536_s6 = sshll.u32 %s532_s29, 4  ;;  %s537_s6 = int_to_ptr.hbm [resolvable:$true] %s536_s6 }
  0xd0   : > { %s785_s25 = sshra.s32 %s537_s6, 4  ;;  %s786_s25 = int_to_ptr.hbm [resolvable:$true] %s785_s25 }
  0xd1   : > { %p792_p12 = scmp.lt.s32.totalorder %s786_s25, %s1078_s5 }
  0xd6   : > { %v363_v21 = vld.sshfl [vmem:[#allocation1 + $0x8] sm:$0xff pattern:$0x75316420]  ;;  %v362_v22 = vld.sshfl [vmem:[#allocation1] sm:$0xff pattern:$0x75316420] }
  0xd7   : > { %366 = vrot.lane.b32.xlu1 %v363_v21, %s851_s8  ;;  %364 = vrot.lane.b32.xlu0 %v362_v22, %s851_s8  ;;  %377 = vst [vmem:[#allocation1] ss:$2 sm:$0xff] %v282_v12  ;;  %s521_s8 = scalar_lea.sflag [#allocation4], %s977_s13 }
  0xde   : > { %v379_v24 = vld.sshfl [vmem:[#allocation1 + $0x8] sm:$0xff pattern:$0x75316420]  ;;  %v378_v25 = vld.sshfl [vmem:[#allocation1] sm:$0xff pattern:$0x75316420] }
  0xdf   : > { %382 = vrot.lane.b32.xlu0 %v379_v24, %s852_s16  ;;  %380 = vrot.lane.b32.xlu2 %v378_v25, %s852_s16  ;;  %393 = vst [vmem:[#allocation1] ss:$2 sm:$0xff] %v282_v12  ;;  %s787_s16 = scalar_lea.hbm %s786_s25, 16 }
  0xe0   : > { %p788_p1 = scmp.ne.s32.totalorder %s786_s25, %s787_s16 }
  0xe2   : > { %p789_p3 = pnand %p788_p1, %p946_p13 }
  0xe4   : > { %p790_p5 = pneg %p789_p3 }
  0xe6   : > { %v394_v30 = vld.sshfl [vmem:[#allocation1] sm:$0xff pattern:$0x75316420]  ;;  %v395_v31 = vld.sshfl [vmem:[#allocation1 + $0x8] sm:$0xff pattern:$0x75316420] }
  0xe7   : > { %325 = vrot.lane.b32.xlu0 %v322_v18, %s849_s30  ;;  %396 = vrot.lane.b32.xlu1 %v394_v30, %s853_s15  ;;  %409 = vst [vmem:[#allocation1] ss:$2 sm:$0xff] %v282_v12  ;;  %v333_v18 = vperm.slane %v995_v23, 2  ;;  %s534_s30 = sshll.u32 %s259_s11, 4  ;;  %s535_s30 = int_to_ptr.vmem [resolvable:$true] %s534_s30 }
  0xee   : > { %v410_v34 = vld.sshfl [vmem:[#allocation1] sm:$0xff pattern:$0x75316420]  ;;  %v411_v35 = vld.sshfl [vmem:[#allocation1 + $0x8] sm:$0xff pattern:$0x75316420] }
  0xef   : > { %398 = vrot.lane.b32.xlu1 %v395_v31, %s853_s15  ;;  %412 = vrot.lane.b32.xlu2 %v410_v34, %s854_s17  ;;  %438 = vst [vmem:[#allocation1] ss:$2 sm:$0xff] %v360_v33  ;;  %v300_v33 = vperm.slane %v998_v27, 0 }
  0xf7   : > { %291 = vrot.lane.b32.xlu1 %v289_v13, %s855_s22  ;;  %414 = vrot.lane.b32.xlu2 %v411_v35, %s854_s17 }
  0xff   : > { %293 = vrot.lane.b32.xlu2 %v290_v14, %s855_s22  ;;  %s791_s22 = scalar_lea.hbm %s1078_s5, 32 }
 0x100   : > { %p793_p8 = scmp.lt.s32.totalorder %s791_s22, %s787_s16 }
 0x102   : > { %p794_p7 = por %p793_p8, %p792_p12 }
 0x104   : > { %p795_p9 = pnand %p794_p7, %p790_p5 }
 0x121   : > { %v324_v36 = vpop.permute.xlu2 %323 }
 0x122   : > { %v331_v61 = vsel %vm327_vm3, 0.0, %v324_v36 }
 0x129   : > { %v342_v37 = vpop.permute.xlu2 %341 }
 0x131   : > { %v310_v38 = vpop.permute.xlu1 %309  ;;  %v308_v40 = vpop.permute.xlu0 %307 }
 0x132   : > { %v315_v3 = vsel %vm311_vm5, 0.0, %v308_v40  ;;  %v312_v7 = vsel %vm311_vm5, %v308_v40, %v310_v38  ;;  %v301_v38 = vperm.slane %v995_v23, 0  ;;  %v334_v40 = vmul.f32 %v332_v54, %v331_v61 }
 0x133   : > { %v318_v17 = vmul.f32 %v316_v57, %v315_v3  ;;  %v319_v31 = vmul.f32 %v317_v62, %v312_v7 }
 0x135   : > { %v427_v27 = vrot.slane %v318_v17, 4 }
 0x139   : > { %v381_v39 = vpop.permute.xlu2 %380 }
 0x141   : > { %v340_v41 = vpop.permute.xlu1 %339 }
 0x142   : > { %v347_v0 = vsel %vm343_vm4, 0.0, %v340_v41  ;;  %v344_v8 = vsel %vm343_vm4, %v340_v41, %v342_v37 }
 0x143   : > { %v350_v9 = vmul.f32 %v348_v58, %v347_v0  ;;  %v351_v21 = vmul.f32 %v349_v63, %v344_v8 }
 0x145   : > { %v433_v32 = vrot.slane %v350_v9, 4  ;;  %v434_v41 = vrot.slane %v351_v21, 4 }
 0x149   : > { %v413_v42 = vpop.permute.xlu2 %412  ;;  %v365_v43 = vpop.permute.xlu0 %364 }
 0x14a   : > { %v367_v46 = vpop.permute.xlu1 %366 }
 0x14b   : > { %v372_v59 = vsel %vm368_vm2, %v367_v46, 0.0  ;;  %v369_v60 = vsel %vm368_vm2, %v365_v43, %v367_v46  ;;  %v428_v46 = vrot.slane %v319_v31, 4 }
 0x14c   : > { %v376_v4 = vmul.f32 %v374_v55, %v372_v59  ;;  %v375_v5 = vmul.f32 %v373_v56, %v369_v60 }
 0x14e   : > { %v446_v22 = vrot.slane %v376_v4, 4  ;;  %v445_v24 = vrot.slane %v375_v5, 4 }
 0x151   : > { %v415_v47 = vpop.permute.xlu2 %414  ;;  %v383_v52 = vpop.permute.xlu0 %382 }
 0x152   : > { %v417_v48 = vsel %vm416_vm1, %v413_v42, %v415_v47  ;;  %v420_v49 = vsel %vm416_vm1, %v415_v47, 0.0  ;;  %v385_v13 = vsel %vm384_vm6, %v381_v39, %v383_v52  ;;  %v388_v14 = vsel %vm384_vm6, %v383_v52, 0.0  ;;  %v439_v39 = vld.sshfl [vmem:[#allocation1] sm:$0xff pattern:$0x75316420] }
 0x153   : > { %v423_v50 = vmul.f32 %v709_v44, %v417_v48  ;;  %v424_v51 = vmul.f32 %v710_v45, %v420_v49  ;;  %v391_v26 = vmul.f32 %v389_v6, %v385_v13  ;;  %v392_v28 = vmul.f32 %v390_v10, %v388_v14  ;;  %v463_v52 = vld [vmem:[%s1074_s1] sm:$0xff] }
 0x154   : > { %v459_v44 = vsel %vm357_vm0, %v439_v39, %v445_v24 }
 0x155   : > { %628 = vmatpush.msk.msra.mxu0 %vm357_vm0, %v423_v50  ;;  %630 = vmatpush.msk.msra.mxu1 %vm357_vm0, %v424_v51  ;;  %v457_v50 = vsel %vm357_vm0, %v334_v40, %v433_v32 }
 0x159   : > { %v397_v53 = vpop.permute.xlu1 %396  ;;  %v326_v11 = vpop.permute.xlu0 %325 }
 0x15a   : > { %v328_v25 = vsel %vm327_vm3, %v324_v36, %v326_v11  ;;  %v440_v36 = vld.sshfl [vmem:[#allocation1 + $0x8] sm:$0xff pattern:$0x75316420]  ;;  %v294_v42 = vpop.permute.xlu2 %293 }
 0x15b   : > { %v335_v34 = vmul.f32 %v333_v18, %v328_v25  ;;  %v460_v45 = vsel %vm357_vm0, %v440_v36, %v446_v22 }
 0x15d   : > { %v458_v51 = vsel %vm357_vm0, %v335_v34, %v434_v41 }
 0x161   : > { %v399_v12 = vpop.permute.xlu1 %398 }
 0x162   : > { %v401_v15 = vsel %vm400_vm7, %v397_v53, %v399_v12  ;;  %v404_v16 = vsel %vm400_vm7, %v399_v12, 0.0 }
 0x163   : > { %v407_v19 = vmul.f32 %v405_v1, %v401_v15  ;;  %v408_v20 = vmul.f32 %v406_v2, %v404_v16 }
 0x165   : > { %v451_v29 = vrot.slane %v407_v19, 4  ;;  %v452_v30 = vrot.slane %v408_v20, 4 }
 0x167   : > { %v461_v35 = vsel %vm357_vm0, %v391_v26, %v451_v29  ;;  %v462_v37 = vsel %vm357_vm0, %v392_v28, %v452_v30 }
 0x168   : > { %486 = vmatpush.msra.mxu0 %v461_v35  ;;  %506 = vmatpush.msra.mxu1 %v462_v37 }
 0x169   : > { %v292_v43 = vpop.permute.xlu1 %291 }
 0x16a   : > { %v296_v47 = vsel %vm295_vm8, %v292_v43, %v294_v42  ;;  %v299_v48 = vsel %vm295_vm8, 0.0, %v292_v43  ;;  %487 = vmatpush.msra.mxu0 %v459_v44  ;;  %507 = vmatpush.msra.mxu1 %v460_v45 }
 0x16b   : > { %v302_v23 = vmul.f32 %v300_v33, %v299_v48  ;;  %v303_v49 = vmul.f32 %v301_v38, %v296_v47 }
 0x16c   : > { %488 = vmatpush.msra.mxu0 %v457_v50  ;;  %508 = vmatpush.msra.mxu1 %v458_v51 }
 0x16d   : > { %v455_v53 = vsel %vm357_vm0, %v302_v23, %v427_v27  ;;  %v456_v54 = vsel %vm357_vm0, %v303_v49, %v428_v46 }
 0x16e   : > { %489 = vmatpush.msra.mxu0 %v455_v53  ;;  %509 = vmatpush.msra.mxu1 %v456_v54 }
 0x16f   : > { %629 = vmatmul.msk.f32.vlgmr.msra.gmra.mxu0 %vm464_vm9, %v463_v52  ;;  %631 = vmatmul.msk.f32.vlgmr.msra.gmra.mxu1 %vm464_vm9, %v463_v52 }
 0x1ec   : > { %v491_v55 = vpop.f32.mrf.mxu0  ;;  %v511_v56 = vpop.f32.mrf.mxu1 }
 0x1ed   : > { %v514_v57 = vmul.f32 0.1, %v491_v55  ;;  %v515_v58 = vmul.f32 0.1, %v511_v56 }
 0x1ef   : > { %v516_v59 = vmax.f32 %v491_v55, %v514_v57  ;;  %v517_v60 = vmax.f32 %v511_v56, %v515_v58 }
 0x1f1   : > { %518 = vst [vmem:[%s259_s11] sm:$0xff] %v516_v59 }
 0x1f2   : > { %519 = vst [vmem:[%s259_s11 + $0x8] sm:$0xff] %v517_v60 }
 0x1f3   : > { %798 = shalt.err (!%p795_p9)
}
 0x1f4   : > { %645 = dma.vmem_to_hbm [thread:$0]  (%p946_p13), %s535_s30, 256, %s537_s6, %s521_s8  }
 0x1f5 PF: > { %s548_s13 = sand.u32 1, %s829_s18   ;;  %p1084_p10 = scmp.ge.s32.totalorder %s841_s21, 2 }
 0x1f6   : > { %s549_s9 = scalar_lea.sflag [#allocation4], %s548_s13 }
 0x1f7   : > { %p656_p11 = pnand %p1084_p10, %p951_p4 }
 0x1f9   : > { %p657_p0 = pneg %p656_p11 }
 0x1fb   : > { %824 = dma.done.wait (%p657_p0), %s549_s9, 256  }
 0x1fc   : > { %826 = vsyncadd (%p657_p0), %s549_s9, 4294967040  ;;  %p19_p2 = scmp.ge.s32.totalorder %s926_s7, 4   ;;  %s1085_s18 = smov %s833_s19 }
 0x1fd   : > { %s1086_s19 = smov %s837_s20  ;;  %s1087_s20 = smov %s938_s10 }
 0x1fe   : > { %s1088_s21 = smov %s926_s7  ;;  %21 = sbr.rel (!%p19_p2) target bundleno = 6 (0x6), region = 89 }
 0x203   :  { %555 = vsyncpa [#allocation3], 1 }
 0x204   :  { %557 = vsyncpa [#allocation3 + $0x1], 1 }
 0x205   :  { %558 = vsyncpa [#allocation6], 1 }
 0x206   :  { %559 = vsyncpa [#allocation4], 1 }
 0x207   :  { %561 = vsyncpa [#allocation4 + $0x1], 1 }

</bundles_post_ra>
